<compile_context>
chip_gen: v7x
topology: tpu7x:2x2x1
jax: 0.10.0
libtpu: 0.0.40
codegen_flags: <defaults>
</compile_context>

<pallas_src>
import jax
import jax.numpy as jnp
from jax.experimental import pallas as pl
from jax.experimental.pallas import tpu as pltpu


def _round_up(x: int, m: int) -> int:
    return ((x + m - 1) // m) * m


def _sublane_tile(dtype) -> int:
    # Sub-32-bit dtypes pack along sublanes: f32 -> 8, bf16 -> 16, int8 -> 32.
    return max(8, 32 // jnp.dtype(dtype).itemsize)


def _triangle_kernel(x_ref, t_ref, out_ref):
    """One (tile_n, tile_d) output tile per grid step.

    x_ref  : (tile_n, 2)      -- row tile of x (both columns)
    t_ref  : (1, tile_d)      -- feature tile of t parameters
    out_ref: (tile_n, tile_d)
    """
    x = x_ref[...]
    x0 = x[:, 0:1]                         # (tile_n, 1)
    x1 = x[:, 1:2]                         # (tile_n, 1)
    t = t_ref[...]                         # (1, tile_d)
    # relu(x1 - |t - x0|); broadcast (tile_n,1) x (1,tile_d) -> (tile_n,tile_d)
    out_ref[...] = jnp.maximum(x1 - jnp.abs(t - x0), 0).astype(out_ref.dtype)


def triangle_transform(x, t_param, *, tile_n=None, out_dtype=None):
    """x: (N, 2), t_param: (D,) -> (N, D)."""
    N = x.shape[0]
    D = t_param.shape[0]
    dtype = x.dtype
    out_dtype = dtype if out_dtype is None else out_dtype
    itemsize = jnp.dtype(out_dtype).itemsize
    sub = max(_sublane_tile(dtype), _sublane_tile(out_dtype))

    # Feature-axis tile: full D when small (block dim == array dim is legal
    # for any D); otherwise 512 lanes (multiple of 128, ragged tail masked).
    tile_d = D if D <= 512 else 512
    grid_d = pl.cdiv(D, tile_d)

    if tile_n is None:
        # Target ~4 MiB of output per grid step; cap at 2048 rows.  Worst case
        # (2048 x 512 x 4B) = 4 MiB/buffer -> 8 MiB double-buffered: well
        # under the 32 MiB scoped VMEM default on every generation (v7x incl.).
        target_bytes = 4 * 1024 * 1024
        tile_n = max(sub, target_bytes // max(tile_d * itemsize, 1))
        tile_n = min(tile_n, 2048)
    tile_n = max(sub, min(tile_n, _round_up(N, sub)))
    tile_n = _round_up(tile_n, sub)
    grid_n = pl.cdiv(N, tile_n)

    # v7x shards "parallel" grid axes across its 2 TensorCores: avoid a 1-step
    # row grid when N is large enough that the split tiles stay >= ~1 MiB
    # (so v5e/v6e don't pay extra per-step overhead on tiny inputs).
    min_row_steps = 4
    if grid_n < min_row_steps:
        alt_tile = _round_up(pl.cdiv(N, min_row_steps), sub)
        if alt_tile * tile_d * itemsize >= (1 << 20):
            tile_n = alt_tile
            grid_n = pl.cdiv(N, tile_n)

    t2d = t_param.reshape(1, D)

    return pl.pallas_call(
        _triangle_kernel,
        out_shape=jax.ShapeDtypeStruct((N, D), out_dtype),
        grid_spec=pl.GridSpec(
            grid=(grid_n, grid_d),
            in_specs=[
                pl.BlockSpec((tile_n, 2), lambda i, j: (i, 0)),    # x rows
                pl.BlockSpec((1, tile_d), lambda i, j: (0, j)),    # t features
            ],
            out_specs=pl.BlockSpec((tile_n, tile_d), lambda i, j: (i, j)),
        ),
        compiler_params=pltpu.CompilerParams(
            dimension_semantics=("parallel", "parallel")),
    )(x, t2d)


def _reference(x, t_param):
    return jnp.maximum(
        x[:, 1][:, None] - jnp.abs(t_param[None, :] - x[:, 0][:, None]), 0.0)


if __name__ == "__main__":
    key = jax.random.PRNGKey(0)
    k1, k2 = jax.random.split(key)

    N, output_dim = 64, 16                      # small shapes consistent with module
    x = jax.random.normal(k1, (N, 2), dtype=jnp.float32)
    # torch.randn(output_dim) * 0.1 equivalent
    t_param = jax.random.normal(k2, (output_dim,), dtype=jnp.float32) * 0.1

    out = triangle_transform(x, t_param)
    jax.block_until_ready(out)

    ref = _reference(x, t_param)
    assert out.shape == (N, output_dim), out.shape
    assert jnp.allclose(out, ref, atol=1e-5, rtol=1e-5), "mismatch vs reference"

    print("KERNEL_OK")
</pallas_src>

<mosaic_0001>
module attributes {stable_mosaic.version = 11 : i64} {
  func.func @_triangle_kernel(%arg0: i32, %arg1: i32, %arg2: memref<64x2xf32, #tpu.memory_space<vmem>>, %arg3: memref<1x16xf32, #tpu.memory_space<vmem>>, %arg4: memref<64x16xf32, #tpu.memory_space<vmem>>) attributes {dimension_semantics = [#tpu.dimension_semantics<parallel>, #tpu.dimension_semantics<parallel>], iteration_bounds = array<i64: 1, 1>, scalar_prefetch = 0 : i64, scratch_operands = 0 : i64, tpu.core_type = #tpu.core_type<tc>, window_params = [{transform_indices = @transform_0, window_bounds = array<i64: 64, 2>}, {transform_indices = @transform_1, window_bounds = array<i64: 1, 16>}, {transform_indices = @transform_2, window_bounds = array<i64: 64, 16>}]} {
    %c0 = arith.constant 0 : index
    %c0_0 = arith.constant 0 : index
    %0 = vector.load %arg2[%c0, %c0_0] : memref<64x2xf32, #tpu.memory_space<vmem>>, vector<64x2xf32>
    %1 = vector.extract_strided_slice %0 {offsets = [0, 0], sizes = [64, 1], strides = [1, 1]} : vector<64x2xf32> to vector<64x1xf32>
    %2 = vector.extract_strided_slice %0 {offsets = [0, 1], sizes = [64, 1], strides = [1, 1]} : vector<64x2xf32> to vector<64x1xf32>
    %c0_1 = arith.constant 0 : index
    %c0_2 = arith.constant 0 : index
    %3 = vector.load %arg3[%c0_1, %c0_2] : memref<1x16xf32, #tpu.memory_space<vmem>>, vector<1x16xf32>
    %4 = vector.broadcast %3 : vector<1x16xf32> to vector<64x16xf32>
    %5 = vector.broadcast %1 : vector<64x1xf32> to vector<64x16xf32>
    %6 = arith.subf %4, %5 : vector<64x16xf32>
    %7 = math.absf %6 : vector<64x16xf32>
    %8 = vector.broadcast %2 : vector<64x1xf32> to vector<64x16xf32>
    %9 = arith.subf %8, %7 : vector<64x16xf32>
    %cst = arith.constant 0.000000e+00 : f32
    %10 = vector.broadcast %cst : f32 to vector<64x16xf32>
    %11 = arith.maximumf %9, %10 : vector<64x16xf32>
    %c0_3 = arith.constant 0 : index
    %c0_4 = arith.constant 0 : index
    %12 = vector.load %arg4[%c0_3, %c0_4] : memref<64x16xf32, #tpu.memory_space<vmem>>, vector<64x16xf32>
    tpu.vector_store %arg4[%c0_3, %c0_4], %11 {strides = array<i32>} : memref<64x16xf32, #tpu.memory_space<vmem>>, vector<64x16xf32>,
    return
  }
  func.func @transform_0(%arg0: i32, %arg1: i32) -> (i32, i32) {
    %c0_i32 = arith.constant 0 : i32
    %c0_i32_0 = arith.constant 0 : i32
    return %arg0, %c0_i32 : i32, i32
  }
  func.func @transform_1(%arg0: i32, %arg1: i32) -> (i32, i32) {
    %c0_i32 = arith.constant 0 : i32
    %c0_i32_0 = arith.constant 0 : i32
    return %c0_i32, %arg1 : i32, i32
  }
  func.func @transform_2(%arg0: i32, %arg1: i32) -> (i32, i32) {
    %c0_i32 = arith.constant 0 : i32
    return %arg0, %arg1 : i32, i32
  }
}

</mosaic_0001>

<bundles_post_ra>
// kernel: tpu_custom_call.1
= control target key start
LH: loop header
LB: loop body
LE: loop exit
PB: predicated region body
PF: predicated region fallthrough
CT: control target
= control target key end

     0   :  { %v150_v0 = vmov 0   ;;  %v151_v9 = vmov 1   ;;  %vm130_vm0 = vcmask 130048   ;;  %s226_s0 = inlined_call_operand.vmem [shape: f32[64,2], index: 0, kind: input, shape index: {}]   ;;  %s227_s1 = inlined_call_operand.vmem [shape: f32[1,16], index: 1, kind: input, shape index: {}]   ;;  %s228_s2 = inlined_call_operand.vmem [shape: f32[64,16], index: 2, kind: output, shape index: {}]  }
   0x1   :  { %147 = vset.pattern.permute.xlu1 %v150_v0  ;;  %146 = vset.pattern.permute.xlu0 %v150_v0  ;;  %v13_v1 = vld [vmem:[%s226_s0 + $0x10] sm:$0xff]  ;;  %v11_v2 = vld [vmem:[%s226_s0] sm:$0xff]  ;;  %v14_v3 = vld [vmem:[%s226_s0 + $0x18] sm:$0xff] }
   0x2   :  { %38 = vperm.xlu1 %147, %v13_v1   ;;  %28 = vperm.xlu0 %146, %v11_v2   ;;  %v12_v4 = vld [vmem:[%s226_s0 + $0x8] sm:$0xff]  ;;  %v15_v6 = vld [vmem:[%s226_s0 + $0x20] sm:$0xff]  ;;  %v18_v7 = vld [vmem:[%s226_s0 + $0x38] sm:$0xff] }
   0x3   :  { %v16_v5 = vld [vmem:[%s226_s0 + $0x28] sm:$0xff]  ;;  %v17_v8 = vld [vmem:[%s226_s0 + $0x30] sm:$0xff]  ;;  %v143_v16 = vld [vmem:[%s227_s1] ss:$0 sm:$0xff] }
   0x6   :  { %43 = vperm.xlu1 %147, %v14_v3   ;;  %33 = vperm.xlu0 %146, %v12_v4  }
   0xa   :  { %53 = vperm.xlu1 %147, %v16_v5   ;;  %48 = vperm.xlu0 %146, %v15_v6  }
   0xe   :  { %63 = vperm.xlu1 %147, %v18_v7   ;;  %58 = vperm.xlu0 %146, %v17_v8  }
  0x12   :  { %149 = vset.pattern.permute.xlu1 %v151_v9  ;;  %148 = vset.pattern.permute.xlu0 %v151_v9 }
  0x13   :  { %87 = vperm.xlu1 %149, %v12_v4   ;;  %83 = vperm.xlu0 %148, %v11_v2  }
  0x17   :  { %91 = vperm.xlu1 %149, %v13_v1   ;;  %95 = vperm.xlu0 %148, %v14_v3  }
  0x1b   :  { %99 = vperm.xlu1 %149, %v15_v6   ;;  %103 = vperm.xlu0 %148, %v16_v5  }
  0x1f   :  { %107 = vperm.xlu1 %149, %v17_v8   ;;  %111 = vperm.xlu0 %148, %v18_v7  }
  0x81   :  { %v39_v10 = vpop.permute.xlu1 %38  ;;  %v29_v11 = vpop.permute.xlu0 %28 }
  0x82   :  { %v66_v17 = vsub.f32 %v143_v16, %v29_v11  ;;  %v68_v21 = vsub.f32 %v143_v16, %v39_v10 }
  0x84   :  { %v74_v22 = vand.u32 2147483647, %v66_v17  ;;  %v76_v31 = vand.u32 2147483647, %v68_v21 }
  0x85   :  { %v44_v12 = vpop.permute.xlu1 %43  ;;  %v34_v13 = vpop.permute.xlu0 %33 }
  0x86   :  { %v67_v18 = vsub.f32 %v143_v16, %v34_v13  ;;  %v69_v23 = vsub.f32 %v143_v16, %v44_v12 }
  0x88   :  { %v75_v24 = vand.u32 2147483647, %v67_v18  ;;  %v77_v32 = vand.u32 2147483647, %v69_v23 }
  0x89   :  { %v54_v14 = vpop.permute.xlu1 %53  ;;  %v49_v15 = vpop.permute.xlu0 %48 }
  0x8a   :  { %v71_v29 = vsub.f32 %v143_v16, %v54_v14  ;;  %v70_v30 = vsub.f32 %v143_v16, %v49_v15 }
  0x8c   :  { %v79_v39 = vand.u32 2147483647, %v71_v29  ;;  %v78_v40 = vand.u32 2147483647, %v70_v30 }
  0x8d   :  { %v64_v19 = vpop.permute.xlu1 %63  ;;  %v59_v20 = vpop.permute.xlu0 %58 }
  0x8e   :  { %v73_v41 = vsub.f32 %v143_v16, %v64_v19  ;;  %v72_v42 = vsub.f32 %v143_v16, %v59_v20 }
  0x90   :  { %v81_v49 = vand.u32 2147483647, %v73_v41  ;;  %v80_v50 = vand.u32 2147483647, %v72_v42 }
  0x92   :  { %v88_v25 = vpop.permute.xlu1 %87  ;;  %v84_v26 = vpop.permute.xlu0 %83 }
  0x93   :  { %v115_v27 = vsub.f32 %v88_v25, %v75_v24  ;;  %v114_v28 = vsub.f32 %v84_v26, %v74_v22 }
  0x95   :  { %v123_v33 = vmax.f32 %v115_v27, 0.0  ;;  %v122_v34 = vmax.f32 %v114_v28, 0.0 }
  0x96   :  { %v92_v35 = vpop.permute.xlu1 %91  ;;  %v96_v36 = vpop.permute.xlu0 %95 }
  0x97   :  { %132 = vst.msk [vmem:[%s228_s2 + $0x8] sm:$0xff] %vm130_vm0, %v123_v33  ;;  %131 = vst.msk [vmem:[%s228_s2] sm:$0xff] %vm130_vm0, %v122_v34  ;;  %v116_v37 = vsub.f32 %v92_v35, %v76_v31  ;;  %v117_v38 = vsub.f32 %v96_v36, %v77_v32 }
  0x99   :  { %v124_v43 = vmax.f32 %v116_v37, 0.0  ;;  %v125_v44 = vmax.f32 %v117_v38, 0.0 }
  0x9a   :  { %v100_v45 = vpop.permute.xlu1 %99  ;;  %v104_v46 = vpop.permute.xlu0 %103 }
  0x9b   :  { %133 = vst.msk [vmem:[%s228_s2 + $0x10] sm:$0xff] %vm130_vm0, %v124_v43  ;;  %134 = vst.msk [vmem:[%s228_s2 + $0x18] sm:$0xff] %vm130_vm0, %v125_v44  ;;  %v118_v47 = vsub.f32 %v100_v45, %v78_v40  ;;  %v119_v48 = vsub.f32 %v104_v46, %v79_v39 }
  0x9d   :  { %v126_v51 = vmax.f32 %v118_v47, 0.0  ;;  %v127_v52 = vmax.f32 %v119_v48, 0.0 }
  0x9e   :  { %v108_v53 = vpop.permute.xlu1 %107  ;;  %v112_v54 = vpop.permute.xlu0 %111 }
  0x9f   :  { %135 = vst.msk [vmem:[%s228_s2 + $0x20] sm:$0xff] %vm130_vm0, %v126_v51  ;;  %136 = vst.msk [vmem:[%s228_s2 + $0x28] sm:$0xff] %vm130_vm0, %v127_v52  ;;  %v120_v55 = vsub.f32 %v108_v53, %v80_v50  ;;  %v121_v56 = vsub.f32 %v112_v54, %v81_v49 }
  0xa1   :  { %v128_v57 = vmax.f32 %v120_v55, 0.0  ;;  %v129_v58 = vmax.f32 %v121_v56, 0.0 }
  0xa3   :  { %137 = vst.msk [vmem:[%s228_s2 + $0x30] sm:$0xff] %vm130_vm0, %v128_v57  ;;  %138 = vst.msk [vmem:[%s228_s2 + $0x38] sm:$0xff] %vm130_vm0, %v129_v58 }

</bundles_post_ra>
